<compile_context>
chip_gen: v6e
topology: v6e:2x2x1
jax: 0.10.0
libtpu: 0.0.40
codegen_flags: <defaults>
</compile_context>

<pallas_src>
import functools

import jax
import jax.numpy as jnp
from jax.experimental import pallas as pl
from jax.experimental.pallas import tpu as pltpu


# ----------------------------- Pallas kernel -------------------------------

def singlecnn_kernel(xp_ref, wf_ref, bf_ref, fcw_ref, fcb_ref, out_ref,
                     *, seq_len, out_channel):
    TB, P, D = xp_ref.shape
    C = out_channel
    out_len = seq_len + 3                       # fused window count (== conv3 len)

    xp = xp_ref[...]                            # (TB, P, D) bf16

    # Build the im2col slab (TB*out_len, 4*D): per batch row, lane-concat the
    # four shifted tap windows; then stack the batch rows along sublanes.
    rows = []
    for b in range(TB):                         # static unroll (TB small)
        taps = [xp[b, dt:dt + out_len, :] for dt in range(4)]
        rows.append(jnp.concatenate(taps, axis=1))          # (out_len, 4*D)
    cols = jnp.concatenate(rows, axis=0)                    # (TB*out_len, 4*D)

    # One fused MXU matmul computes conv1/conv2/conv3 for every row & position.
    y = jnp.dot(cols, wf_ref[...], preferred_element_type=jnp.float32)  # (TB*out_len, 3C)
    y = jnp.maximum(y + bf_ref[...], 0.0)       # bias + ReLU (f32)

    # Validity mask: conv with kernel k only has seq_len + k - 1 positions.
    # (ReLU >= 0 so zeroing the invalid tail positions is max-neutral.)
    row_j = jax.lax.broadcasted_iota(jnp.int32, (out_len, 3 * C), 0)
    col_c = jax.lax.broadcasted_iota(jnp.int32, (out_len, 3 * C), 1)
    limit = (seq_len + 1) + (col_c >= C).astype(jnp.int32) \
                          + (col_c >= 2 * C).astype(jnp.int32)
    valid = row_j < limit                                    # (out_len, 3C)

    # Full-length max-pool per batch row.
    feats = []
    for b in range(TB):
        yb = y[b * out_len:(b + 1) * out_len, :]
        yb = jnp.where(valid, yb, 0.0)
        feats.append(jnp.max(yb, axis=0, keepdims=True))     # (1, 3C)
    feat = jnp.concatenate(feats, axis=0)                    # (TB, 3C)

    # dropout(p=0.5) is identity in eval mode.
    # fc1 on the lane-padded label dim (padded columns have zero weight/bias).
    logit = jnp.dot(feat.astype(fcw_ref.dtype), fcw_ref[...],
                    preferred_element_type=jnp.float32) + fcb_ref[...]   # (TB, LPAD)

    # L2 row-normalize (F.normalize, eps=1e-12); padded zero columns don't
    # change the norm.
    nrm = jnp.sqrt(jnp.sum(logit * logit, axis=1, keepdims=True))
    out_ref[...] = logit / jnp.maximum(nrm, 1e-12)


# ------------------------------ wrapper -------------------------------------

def singlecnn_forward(text, params, *, seq_len, words_dim, out_channel, label,
                      block_b=8):
    S, D, C = seq_len, words_dim, out_channel
    P = S + 6                                   # single pad of 3 on each side

    # --- glue: embedding gather + layout ---
    x = params["embed"][text]                   # (S, B, D)
    x = jnp.transpose(x, (1, 0, 2))             # (B, S, D)
    B = x.shape[0]

    # batch blocking (TB rows per grid step; pad batch to a multiple of TB)
    TB = block_b
    B_pad = ((B + TB - 1) // TB) * TB
    xp = jnp.pad(x, ((0, B_pad - B), (3, 3), (0, 0))).astype(jnp.bfloat16)  # (B_pad, P, D)

    # Fused conv weight: zero-pad k=2/k=3 filters to 4 taps, concat channels.
    def pad_taps(w, k):                         # (C,1,k,D) -> (4, D, C)
        wt = jnp.transpose(w[:, 0], (1, 2, 0))  # (k, D, C)
        return jnp.pad(wt, ((4 - k, 0), (0, 0), (0, 0)))
    wf = jnp.concatenate(
        [pad_taps(params["conv1_w"], 2),
         pad_taps(params["conv2_w"], 3),
         pad_taps(params["conv3_w"], 4)], axis=2)            # (4, D, 3C)
    wf = wf.reshape(4 * D, 3 * C).astype(jnp.bfloat16)       # (4D, 3C)

    bf = jnp.concatenate([params["conv1_b"], params["conv2_b"],
                          params["conv3_b"]])[None, :].astype(jnp.float32)  # (1, 3C)

    # FC weight/bias, lane-padded so the output store is lane-dense.
    LPAD = max(128, ((label + 127) // 128) * 128)
    fcw = jnp.zeros((3 * C, LPAD), jnp.float32).at[:, :label].set(params["fc_w"].T)
    fcw = fcw.astype(jnp.bfloat16)                           # (3C, LPAD)
    fcb = jnp.zeros((1, LPAD), jnp.float32).at[:, :label].set(params["fc_b"][None, :])

    kernel = functools.partial(singlecnn_kernel, seq_len=S, out_channel=C)
    out = pl.pallas_call(
        kernel,
        out_shape=jax.ShapeDtypeStruct((B_pad, LPAD), jnp.float32),
        grid=(B_pad // TB,),
        in_specs=[
            pl.BlockSpec((TB, P, D), lambda i: (i, 0, 0)),
            # weights/biases: constant index_map -> resident across grid steps
            pl.BlockSpec((4 * D, 3 * C), lambda i: (0, 0)),
            pl.BlockSpec((1, 3 * C), lambda i: (0, 0)),
            pl.BlockSpec((3 * C, LPAD), lambda i: (0, 0)),
            pl.BlockSpec((1, LPAD), lambda i: (0, 0)),
        ],
        out_specs=pl.BlockSpec((TB, LPAD), lambda i: (i, 0)),
        # each grid step owns a distinct output block -> batch axis is parallel
        # (lets Mosaic shard it across TCs on v7x). If TB is raised a lot,
        # also raise vmem_limit_bytes here.
        compiler_params=pltpu.CompilerParams(dimension_semantics=("parallel",)),
    )(xp, wf, bf, fcw, fcb)

    return out[:B, :label]


# --------------------------- pure-JAX reference ------------------------------

def ref_forward(text, params):
    x = params["embed"][text]                              # (S, B, D)
    x = jnp.transpose(x, (1, 0, 2))[:, None, :, :]         # (B, 1, S, D)  NCHW
    feats = []
    for idx, k in ((1, 2), (2, 3), (3, 4)):
        w = params[f"conv{idx}_w"]                         # (C, 1, k, D)
        b = params[f"conv{idx}_b"]
        y = jax.lax.conv_general_dilated(
            x, w, window_strides=(1, 1), padding=[(k - 1, k - 1), (0, 0)],
            dimension_numbers=("NCHW", "OIHW", "NCHW"))
        y = jnp.maximum(y + b[None, :, None, None], 0.0)[..., 0]   # (B, C, L)
        feats.append(jnp.max(y, axis=2))
    feat = jnp.concatenate(feats, axis=1)                  # (B, 3C)
    logit = feat @ params["fc_w"].T + params["fc_b"]       # (B, label)
    nrm = jnp.sqrt(jnp.sum(logit ** 2, axis=1, keepdims=True))
    return logit / jnp.maximum(nrm, 1e-12)


# --------------------------------- main --------------------------------------

if __name__ == "__main__":
    words_num = 100
    words_dim = 32
    out_channel = 8
    label = 4
    seq_len = 8
    batch = 2

    key = jax.random.PRNGKey(0)
    ks = jax.random.split(key, 10)
    params = {
        "embed":   jax.random.normal(ks[0], (words_num, words_dim), jnp.float32),
        "conv1_w": 0.1 * jax.random.normal(ks[1], (out_channel, 1, 2, words_dim), jnp.float32),
        "conv1_b": 0.1 * jax.random.normal(ks[2], (out_channel,), jnp.float32),
        "conv2_w": 0.1 * jax.random.normal(ks[3], (out_channel, 1, 3, words_dim), jnp.float32),
        "conv2_b": 0.1 * jax.random.normal(ks[4], (out_channel,), jnp.float32),
        "conv3_w": 0.1 * jax.random.normal(ks[5], (out_channel, 1, 4, words_dim), jnp.float32),
        "conv3_b": 0.1 * jax.random.normal(ks[6], (out_channel,), jnp.float32),
        "fc_w":    0.1 * jax.random.normal(ks[7], (label, 3 * out_channel), jnp.float32),
        "fc_b":    0.1 * jax.random.normal(ks[8], (label,), jnp.float32),
    }
    # text follows the torchtext (seq_len, batch) int convention implied by transpose(0,1)
    text = jax.random.randint(ks[9], (seq_len, batch), 0, words_num, jnp.int32)

    out = jax.block_until_ready(
        singlecnn_forward(text, params, seq_len=seq_len, words_dim=words_dim,
                          out_channel=out_channel, label=label))
    ref = jax.block_until_ready(ref_forward(text, params))

    assert out.shape == (batch, label), out.shape
    assert jnp.allclose(out, ref, atol=3e-2, rtol=3e-2), (out, ref)
    print("KERNEL_OK")
</pallas_src>

<mosaic_0001>
module attributes {stable_mosaic.version = 11 : i64} {
  func.func @singlecnn_kernel(%arg0: i32, %arg1: memref<8x14x32xbf16, #tpu.memory_space<vmem>>, %arg2: memref<128x24xbf16, #tpu.memory_space<vmem>>, %arg3: memref<1x24xf32, #tpu.memory_space<vmem>>, %arg4: memref<24x128xbf16, #tpu.memory_space<vmem>>, %arg5: memref<1x128xf32, #tpu.memory_space<vmem>>, %arg6: memref<8x128xf32, #tpu.memory_space<vmem>>) attributes {dimension_semantics = [#tpu.dimension_semantics<parallel>], iteration_bounds = array<i64: 1>, scalar_prefetch = 0 : i64, scratch_operands = 0 : i64, tpu.core_type = #tpu.core_type<tc>, window_params = [{transform_indices = @transform_0, window_bounds = array<i64: 8, 14, 32>}, {pipeline_mode = #tpu.pipeline_mode<synchronous>, transform_indices = @transform_1, window_bounds = array<i64: 128, 24>}, {pipeline_mode = #tpu.pipeline_mode<synchronous>, transform_indices = @transform_2, window_bounds = array<i64: 1, 24>}, {pipeline_mode = #tpu.pipeline_mode<synchronous>, transform_indices = @transform_3, window_bounds = array<i64: 24, 128>}, {pipeline_mode = #tpu.pipeline_mode<synchronous>, transform_indices = @transform_4, window_bounds = array<i64: 1, 128>}, {transform_indices = @transform_5, window_bounds = array<i64: 8, 128>}]} {
    %c0 = arith.constant 0 : index
    %c0_0 = arith.constant 0 : index
    %c0_1 = arith.constant 0 : index
    %0 = vector.load %arg1[%c0, %c0_0, %c0_1] : memref<8x14x32xbf16, #tpu.memory_space<vmem>>, vector<8x14x32xbf16>
    %1 = vector.extract_strided_slice %0 {offsets = [0, 0, 0], sizes = [1, 11, 32], strides = [1, 1, 1]} : vector<8x14x32xbf16> to vector<1x11x32xbf16>
    %2 = vector.shape_cast %1 : vector<1x11x32xbf16> to vector<11x32xbf16>
    %3 = vector.extract_strided_slice %0 {offsets = [0, 1, 0], sizes = [1, 11, 32], strides = [1, 1, 1]} : vector<8x14x32xbf16> to vector<1x11x32xbf16>
    %4 = vector.shape_cast %3 : vector<1x11x32xbf16> to vector<11x32xbf16>
    %5 = vector.extract_strided_slice %0 {offsets = [0, 2, 0], sizes = [1, 11, 32], strides = [1, 1, 1]} : vector<8x14x32xbf16> to vector<1x11x32xbf16>
    %6 = vector.shape_cast %5 : vector<1x11x32xbf16> to vector<11x32xbf16>
    %7 = vector.extract_strided_slice %0 {offsets = [0, 3, 0], sizes = [1, 11, 32], strides = [1, 1, 1]} : vector<8x14x32xbf16> to vector<1x11x32xbf16>
    %8 = vector.shape_cast %7 : vector<1x11x32xbf16> to vector<11x32xbf16>
    %9 = tpu.concatenate %2, %4, %6, %8 in 1 : vector<11x32xbf16>, vector<11x32xbf16>, vector<11x32xbf16>, vector<11x32xbf16> -> vector<11x128xbf16>
    %10 = vector.extract_strided_slice %0 {offsets = [1, 0, 0], sizes = [1, 11, 32], strides = [1, 1, 1]} : vector<8x14x32xbf16> to vector<1x11x32xbf16>
    %11 = vector.shape_cast %10 : vector<1x11x32xbf16> to vector<11x32xbf16>
    %12 = vector.extract_strided_slice %0 {offsets = [1, 1, 0], sizes = [1, 11, 32], strides = [1, 1, 1]} : vector<8x14x32xbf16> to vector<1x11x32xbf16>
    %13 = vector.shape_cast %12 : vector<1x11x32xbf16> to vector<11x32xbf16>
    %14 = vector.extract_strided_slice %0 {offsets = [1, 2, 0], sizes = [1, 11, 32], strides = [1, 1, 1]} : vector<8x14x32xbf16> to vector<1x11x32xbf16>
    %15 = vector.shape_cast %14 : vector<1x11x32xbf16> to vector<11x32xbf16>
    %16 = vector.extract_strided_slice %0 {offsets = [1, 3, 0], sizes = [1, 11, 32], strides = [1, 1, 1]} : vector<8x14x32xbf16> to vector<1x11x32xbf16>
    %17 = vector.shape_cast %16 : vector<1x11x32xbf16> to vector<11x32xbf16>
    %18 = tpu.concatenate %11, %13, %15, %17 in 1 : vector<11x32xbf16>, vector<11x32xbf16>, vector<11x32xbf16>, vector<11x32xbf16> -> vector<11x128xbf16>
    %19 = vector.extract_strided_slice %0 {offsets = [2, 0, 0], sizes = [1, 11, 32], strides = [1, 1, 1]} : vector<8x14x32xbf16> to vector<1x11x32xbf16>
    %20 = vector.shape_cast %19 : vector<1x11x32xbf16> to vector<11x32xbf16>
    %21 = vector.extract_strided_slice %0 {offsets = [2, 1, 0], sizes = [1, 11, 32], strides = [1, 1, 1]} : vector<8x14x32xbf16> to vector<1x11x32xbf16>
    %22 = vector.shape_cast %21 : vector<1x11x32xbf16> to vector<11x32xbf16>
    %23 = vector.extract_strided_slice %0 {offsets = [2, 2, 0], sizes = [1, 11, 32], strides = [1, 1, 1]} : vector<8x14x32xbf16> to vector<1x11x32xbf16>
    %24 = vector.shape_cast %23 : vector<1x11x32xbf16> to vector<11x32xbf16>
    %25 = vector.extract_strided_slice %0 {offsets = [2, 3, 0], sizes = [1, 11, 32], strides = [1, 1, 1]} : vector<8x14x32xbf16> to vector<1x11x32xbf16>
    %26 = vector.shape_cast %25 : vector<1x11x32xbf16> to vector<11x32xbf16>
    %27 = tpu.concatenate %20, %22, %24, %26 in 1 : vector<11x32xbf16>, vector<11x32xbf16>, vector<11x32xbf16>, vector<11x32xbf16> -> vector<11x128xbf16>
    %28 = vector.extract_strided_slice %0 {offsets = [3, 0, 0], sizes = [1, 11, 32], strides = [1, 1, 1]} : vector<8x14x32xbf16> to vector<1x11x32xbf16>
    %29 = vector.shape_cast %28 : vector<1x11x32xbf16> to vector<11x32xbf16>
    %30 = vector.extract_strided_slice %0 {offsets = [3, 1, 0], sizes = [1, 11, 32], strides = [1, 1, 1]} : vector<8x14x32xbf16> to vector<1x11x32xbf16>
    %31 = vector.shape_cast %30 : vector<1x11x32xbf16> to vector<11x32xbf16>
    %32 = vector.extract_strided_slice %0 {offsets = [3, 2, 0], sizes = [1, 11, 32], strides = [1, 1, 1]} : vector<8x14x32xbf16> to vector<1x11x32xbf16>
    %33 = vector.shape_cast %32 : vector<1x11x32xbf16> to vector<11x32xbf16>
    %34 = vector.extract_strided_slice %0 {offsets = [3, 3, 0], sizes = [1, 11, 32], strides = [1, 1, 1]} : vector<8x14x32xbf16> to vector<1x11x32xbf16>
    %35 = vector.shape_cast %34 : vector<1x11x32xbf16> to vector<11x32xbf16>
    %36 = tpu.concatenate %29, %31, %33, %35 in 1 : vector<11x32xbf16>, vector<11x32xbf16>, vector<11x32xbf16>, vector<11x32xbf16> -> vector<11x128xbf16>
    %37 = vector.extract_strided_slice %0 {offsets = [4, 0, 0], sizes = [1, 11, 32], strides = [1, 1, 1]} : vector<8x14x32xbf16> to vector<1x11x32xbf16>
    %38 = vector.shape_cast %37 : vector<1x11x32xbf16> to vector<11x32xbf16>
    %39 = vector.extract_strided_slice %0 {offsets = [4, 1, 0], sizes = [1, 11, 32], strides = [1, 1, 1]} : vector<8x14x32xbf16> to vector<1x11x32xbf16>
    %40 = vector.shape_cast %39 : vector<1x11x32xbf16> to vector<11x32xbf16>
    %41 = vector.extract_strided_slice %0 {offsets = [4, 2, 0], sizes = [1, 11, 32], strides = [1, 1, 1]} : vector<8x14x32xbf16> to vector<1x11x32xbf16>
    %42 = vector.shape_cast %41 : vector<1x11x32xbf16> to vector<11x32xbf16>
    %43 = vector.extract_strided_slice %0 {offsets = [4, 3, 0], sizes = [1, 11, 32], strides = [1, 1, 1]} : vector<8x14x32xbf16> to vector<1x11x32xbf16>
    %44 = vector.shape_cast %43 : vector<1x11x32xbf16> to vector<11x32xbf16>
    %45 = tpu.concatenate %38, %40, %42, %44 in 1 : vector<11x32xbf16>, vector<11x32xbf16>, vector<11x32xbf16>, vector<11x32xbf16> -> vector<11x128xbf16>
    %46 = vector.extract_strided_slice %0 {offsets = [5, 0, 0], sizes = [1, 11, 32], strides = [1, 1, 1]} : vector<8x14x32xbf16> to vector<1x11x32xbf16>
    %47 = vector.shape_cast %46 : vector<1x11x32xbf16> to vector<11x32xbf16>
    %48 = vector.extract_strided_slice %0 {offsets = [5, 1, 0], sizes = [1, 11, 32], strides = [1, 1, 1]} : vector<8x14x32xbf16> to vector<1x11x32xbf16>
    %49 = vector.shape_cast %48 : vector<1x11x32xbf16> to vector<11x32xbf16>
    %50 = vector.extract_strided_slice %0 {offsets = [5, 2, 0], sizes = [1, 11, 32], strides = [1, 1, 1]} : vector<8x14x32xbf16> to vector<1x11x32xbf16>
    %51 = vector.shape_cast %50 : vector<1x11x32xbf16> to vector<11x32xbf16>
    %52 = vector.extract_strided_slice %0 {offsets = [5, 3, 0], sizes = [1, 11, 32], strides = [1, 1, 1]} : vector<8x14x32xbf16> to vector<1x11x32xbf16>
    %53 = vector.shape_cast %52 : vector<1x11x32xbf16> to vector<11x32xbf16>
    %54 = tpu.concatenate %47, %49, %51, %53 in 1 : vector<11x32xbf16>, vector<11x32xbf16>, vector<11x32xbf16>, vector<11x32xbf16> -> vector<11x128xbf16>
    %55 = vector.extract_strided_slice %0 {offsets = [6, 0, 0], sizes = [1, 11, 32], strides = [1, 1, 1]} : vector<8x14x32xbf16> to vector<1x11x32xbf16>
    %56 = vector.shape_cast %55 : vector<1x11x32xbf16> to vector<11x32xbf16>
    %57 = vector.extract_strided_slice %0 {offsets = [6, 1, 0], sizes = [1, 11, 32], strides = [1, 1, 1]} : vector<8x14x32xbf16> to vector<1x11x32xbf16>
    %58 = vector.shape_cast %57 : vector<1x11x32xbf16> to vector<11x32xbf16>
    %59 = vector.extract_strided_slice %0 {offsets = [6, 2, 0], sizes = [1, 11, 32], strides = [1, 1, 1]} : vector<8x14x32xbf16> to vector<1x11x32xbf16>
    %60 = vector.shape_cast %59 : vector<1x11x32xbf16> to vector<11x32xbf16>
    %61 = vector.extract_strided_slice %0 {offsets = [6, 3, 0], sizes = [1, 11, 32], strides = [1, 1, 1]} : vector<8x14x32xbf16> to vector<1x11x32xbf16>
    %62 = vector.shape_cast %61 : vector<1x11x32xbf16> to vector<11x32xbf16>
    %63 = tpu.concatenate %56, %58, %60, %62 in 1 : vector<11x32xbf16>, vector<11x32xbf16>, vector<11x32xbf16>, vector<11x32xbf16> -> vector<11x128xbf16>
    %64 = vector.extract_strided_slice %0 {offsets = [7, 0, 0], sizes = [1, 11, 32], strides = [1, 1, 1]} : vector<8x14x32xbf16> to vector<1x11x32xbf16>
    %65 = vector.shape_cast %64 : vector<1x11x32xbf16> to vector<11x32xbf16>
    %66 = vector.extract_strided_slice %0 {offsets = [7, 1, 0], sizes = [1, 11, 32], strides = [1, 1, 1]} : vector<8x14x32xbf16> to vector<1x11x32xbf16>
    %67 = vector.shape_cast %66 : vector<1x11x32xbf16> to vector<11x32xbf16>
    %68 = vector.extract_strided_slice %0 {offsets = [7, 2, 0], sizes = [1, 11, 32], strides = [1, 1, 1]} : vector<8x14x32xbf16> to vector<1x11x32xbf16>
    %69 = vector.shape_cast %68 : vector<1x11x32xbf16> to vector<11x32xbf16>
    %70 = vector.extract_strided_slice %0 {offsets = [7, 3, 0], sizes = [1, 11, 32], strides = [1, 1, 1]} : vector<8x14x32xbf16> to vector<1x11x32xbf16>
    %71 = vector.shape_cast %70 : vector<1x11x32xbf16> to vector<11x32xbf16>
    %72 = tpu.concatenate %65, %67, %69, %71 in 1 : vector<11x32xbf16>, vector<11x32xbf16>, vector<11x32xbf16>, vector<11x32xbf16> -> vector<11x128xbf16>
    %73 = tpu.concatenate %9, %18, %27, %36, %45, %54, %63, %72 in 0 : vector<11x128xbf16>, vector<11x128xbf16>, vector<11x128xbf16>, vector<11x128xbf16>, vector<11x128xbf16>, vector<11x128xbf16>, vector<11x128xbf16>, vector<11x128xbf16> -> vector<88x128xbf16>
    %c0_2 = arith.constant 0 : index
    %c0_3 = arith.constant 0 : index
    %74 = vector.load %arg2[%c0_2, %c0_3] : memref<128x24xbf16, #tpu.memory_space<vmem>>, vector<128x24xbf16>
    %cst = arith.constant dense<0.000000e+00> : vector<88x24xf32>
    %75 = tpu.matmul %73, %74, %cst {dimension_numbers = #tpu.dot_dimension_numbers<[1], [0], [0], [1], [0, 0, 1, 1], [], []>} : vector<88x128xbf16>, vector<128x24xbf16>, vector<88x24xf32> -> vector<88x24xf32>
    %c0_4 = arith.constant 0 : index
    %c0_5 = arith.constant 0 : index
    %76 = vector.load %arg3[%c0_4, %c0_5] : memref<1x24xf32, #tpu.memory_space<vmem>>, vector<1x24xf32>
    %77 = vector.broadcast %76 : vector<1x24xf32> to vector<88x24xf32>
    %78 = arith.addf %75, %77 : vector<88x24xf32>
    %cst_6 = arith.constant 0.000000e+00 : f32
    %79 = vector.broadcast %cst_6 : f32 to vector<88x24xf32>
    %80 = arith.maximumf %78, %79 : vector<88x24xf32>
    %81 = tpu.iota {dimensions = array<i32: 0>} : vector<11x24xi32>
    %82 = tpu.iota {dimensions = array<i32: 1>} : vector<11x24xi32>
    %c8_i32 = arith.constant 8 : i32
    %83 = vector.broadcast %c8_i32 : i32 to vector<11x24xi32>
    %84 = arith.cmpi sge, %82, %83 : vector<11x24xi32>
    %85 = arith.extui %84 : vector<11x24xi1> to vector<11x24xi32>
    %c9_i32 = arith.constant 9 : i32
    %86 = vector.broadcast %c9_i32 : i32 to vector<11x24xi32>
    %87 = arith.addi %86, %85 : vector<11x24xi32>
    %c16_i32 = arith.constant 16 : i32
    %88 = vector.broadcast %c16_i32 : i32 to vector<11x24xi32>
    %89 = arith.cmpi sge, %82, %88 : vector<11x24xi32>
    %90 = arith.extui %89 : vector<11x24xi1> to vector<11x24xi32>
    %91 = arith.addi %87, %90 : vector<11x24xi32>
    %92 = arith.cmpi slt, %81, %91 : vector<11x24xi32>
    %93 = vector.extract_strided_slice %80 {offsets = [0, 0], sizes = [11, 24], strides = [1, 1]} : vector<88x24xf32> to vector<11x24xf32>
    %cst_7 = arith.constant 0.000000e+00 : f32
    %94 = vector.broadcast %cst_7 : f32 to vector<11x24xf32>
    %95 = arith.select %92, %93, %94 : vector<11x24xi1>, vector<11x24xf32>
    %cst_8 = arith.constant dense<0xFF800000> : vector<24xf32>
    %96 = vector.multi_reduction <maximumf>, %95, %cst_8 [0] : vector<11x24xf32> to vector<24xf32>
    %97 = vector.shape_cast %96 : vector<24xf32> to vector<1x24xf32>
    %98 = vector.extract_strided_slice %80 {offsets = [11, 0], sizes = [11, 24], strides = [1, 1]} : vector<88x24xf32> to vector<11x24xf32>
    %cst_9 = arith.constant 0.000000e+00 : f32
    %99 = vector.broadcast %cst_9 : f32 to vector<11x24xf32>
    %100 = arith.select %92, %98, %99 : vector<11x24xi1>, vector<11x24xf32>
    %cst_10 = arith.constant dense<0xFF800000> : vector<24xf32>
    %101 = vector.multi_reduction <maximumf>, %100, %cst_10 [0] : vector<11x24xf32> to vector<24xf32>
    %102 = vector.shape_cast %101 : vector<24xf32> to vector<1x24xf32>
    %103 = vector.extract_strided_slice %80 {offsets = [22, 0], sizes = [11, 24], strides = [1, 1]} : vector<88x24xf32> to vector<11x24xf32>
    %cst_11 = arith.constant 0.000000e+00 : f32
    %104 = vector.broadcast %cst_11 : f32 to vector<11x24xf32>
    %105 = arith.select %92, %103, %104 : vector<11x24xi1>, vector<11x24xf32>
    %cst_12 = arith.constant dense<0xFF800000> : vector<24xf32>
    %106 = vector.multi_reduction <maximumf>, %105, %cst_12 [0] : vector<11x24xf32> to vector<24xf32>
    %107 = vector.shape_cast %106 : vector<24xf32> to vector<1x24xf32>
    %108 = vector.extract_strided_slice %80 {offsets = [33, 0], sizes = [11, 24], strides = [1, 1]} : vector<88x24xf32> to vector<11x24xf32>
    %cst_13 = arith.constant 0.000000e+00 : f32
    %109 = vector.broadcast %cst_13 : f32 to vector<11x24xf32>
    %110 = arith.select %92, %108, %109 : vector<11x24xi1>, vector<11x24xf32>
    %cst_14 = arith.constant dense<0xFF800000> : vector<24xf32>
    %111 = vector.multi_reduction <maximumf>, %110, %cst_14 [0] : vector<11x24xf32> to vector<24xf32>
    %112 = vector.shape_cast %111 : vector<24xf32> to vector<1x24xf32>
    %113 = vector.extract_strided_slice %80 {offsets = [44, 0], sizes = [11, 24], strides = [1, 1]} : vector<88x24xf32> to vector<11x24xf32>
    %cst_15 = arith.constant 0.000000e+00 : f32
    %114 = vector.broadcast %cst_15 : f32 to vector<11x24xf32>
    %115 = arith.select %92, %113, %114 : vector<11x24xi1>, vector<11x24xf32>
    %cst_16 = arith.constant dense<0xFF800000> : vector<24xf32>
    %116 = vector.multi_reduction <maximumf>, %115, %cst_16 [0] : vector<11x24xf32> to vector<24xf32>
    %117 = vector.shape_cast %116 : vector<24xf32> to vector<1x24xf32>
    %118 = vector.extract_strided_slice %80 {offsets = [55, 0], sizes = [11, 24], strides = [1, 1]} : vector<88x24xf32> to vector<11x24xf32>
    %cst_17 = arith.constant 0.000000e+00 : f32
    %119 = vector.broadcast %cst_17 : f32 to vector<11x24xf32>
    %120 = arith.select %92, %118, %119 : vector<11x24xi1>, vector<11x24xf32>
    %cst_18 = arith.constant dense<0xFF800000> : vector<24xf32>
    %121 = vector.multi_reduction <maximumf>, %120, %cst_18 [0] : vector<11x24xf32> to vector<24xf32>
    %122 = vector.shape_cast %121 : vector<24xf32> to vector<1x24xf32>
    %123 = vector.extract_strided_slice %80 {offsets = [66, 0], sizes = [11, 24], strides = [1, 1]} : vector<88x24xf32> to vector<11x24xf32>
    %cst_19 = arith.constant 0.000000e+00 : f32
    %124 = vector.broadcast %cst_19 : f32 to vector<11x24xf32>
    %125 = arith.select %92, %123, %124 : vector<11x24xi1>, vector<11x24xf32>
    %cst_20 = arith.constant dense<0xFF800000> : vector<24xf32>
    %126 = vector.multi_reduction <maximumf>, %125, %cst_20 [0] : vector<11x24xf32> to vector<24xf32>
    %127 = vector.shape_cast %126 : vector<24xf32> to vector<1x24xf32>
    %128 = vector.extract_strided_slice %80 {offsets = [77, 0], sizes = [11, 24], strides = [1, 1]} : vector<88x24xf32> to vector<11x24xf32>
    %cst_21 = arith.constant 0.000000e+00 : f32
    %129 = vector.broadcast %cst_21 : f32 to vector<11x24xf32>
    %130 = arith.select %92, %128, %129 : vector<11x24xi1>, vector<11x24xf32>
    %cst_22 = arith.constant dense<0xFF800000> : vector<24xf32>
    %131 = vector.multi_reduction <maximumf>, %130, %cst_22 [0] : vector<11x24xf32> to vector<24xf32>
    %132 = vector.shape_cast %131 : vector<24xf32> to vector<1x24xf32>
    %133 = tpu.concatenate %97, %102, %107, %112, %117, %122, %127, %132 in 0 : vector<1x24xf32>, vector<1x24xf32>, vector<1x24xf32>, vector<1x24xf32>, vector<1x24xf32>, vector<1x24xf32>, vector<1x24xf32>, vector<1x24xf32> -> vector<8x24xf32>
    %134 = arith.truncf %133 : vector<8x24xf32> to vector<8x24xbf16>
    %c0_23 = arith.constant 0 : index
    %c0_24 = arith.constant 0 : index
    %135 = vector.load %arg4[%c0_23, %c0_24] : memref<24x128xbf16, #tpu.memory_space<vmem>>, vector<24x128xbf16>
    %cst_25 = arith.constant dense<0.000000e+00> : vector<8x128xf32>
    %136 = tpu.matmul %134, %135, %cst_25 {dimension_numbers = #tpu.dot_dimension_numbers<[1], [0], [0], [1], [0, 0, 1, 1], [], []>} : vector<8x24xbf16>, vector<24x128xbf16>, vector<8x128xf32> -> vector<8x128xf32>
    %c0_26 = arith.constant 0 : index
    %c0_27 = arith.constant 0 : index
    %137 = vector.load %arg5[%c0_26, %c0_27] : memref<1x128xf32, #tpu.memory_space<vmem>>, vector<1x128xf32>
    %138 = vector.broadcast %137 : vector<1x128xf32> to vector<8x128xf32>
    %139 = arith.addf %136, %138 : vector<8x128xf32>
    %140 = arith.mulf %139, %139 : vector<8x128xf32>
    %cst_28 = arith.constant dense<0.000000e+00> : vector<8xf32>
    %141 = vector.multi_reduction <add>, %140, %cst_28 [1] : vector<8x128xf32> to vector<8xf32>
    %142 = vector.shape_cast %141 : vector<8xf32> to vector<8x1xf32>
    %143 = math.sqrt %142 : vector<8x1xf32>
    %cst_29 = arith.constant 9.99999996E-13 : f32
    %144 = vector.broadcast %cst_29 : f32 to vector<8x1xf32>
    %145 = arith.maximumf %143, %144 : vector<8x1xf32>
    %146 = vector.broadcast %145 : vector<8x1xf32> to vector<8x128xf32>
    %147 = arith.divf %139, %146 : vector<8x128xf32>
    %c0_30 = arith.constant 0 : index
    %c0_31 = arith.constant 0 : index
    %148 = vector.load %arg6[%c0_30, %c0_31] : memref<8x128xf32, #tpu.memory_space<vmem>>, vector<8x128xf32>
    tpu.vector_store %arg6[%c0_30, %c0_31], %147 {strides = array<i32>} : memref<8x128xf32, #tpu.memory_space<vmem>>, vector<8x128xf32>,
    return
  }
  func.func @transform_0(%arg0: i32) -> (i32, i32, i32) {
    %c0_i32 = arith.constant 0 : i32
    %c0_i32_0 = arith.constant 0 : i32
    %c0_i32_1 = arith.constant 0 : i32
    return %arg0, %c0_i32, %c0_i32_0 : i32, i32, i32
  }
  func.func @transform_1(%arg0: i32) -> (i32, i32) {
    %c0_i32 = arith.constant 0 : i32
    %c0_i32_0 = arith.constant 0 : i32
    %c0_i32_1 = arith.constant 0 : i32
    return %c0_i32, %c0_i32_0 : i32, i32
  }
  func.func @transform_2(%arg0: i32) -> (i32, i32) {
    %c0_i32 = arith.constant 0 : i32
    %c0_i32_0 = arith.constant 0 : i32
    %c0_i32_1 = arith.constant 0 : i32
    return %c0_i32, %c0_i32_0 : i32, i32
  }
  func.func @transform_3(%arg0: i32) -> (i32, i32) {
    %c0_i32 = arith.constant 0 : i32
    %c0_i32_0 = arith.constant 0 : i32
    %c0_i32_1 = arith.constant 0 : i32
    return %c0_i32, %c0_i32_0 : i32, i32
  }
  func.func @transform_4(%arg0: i32) -> (i32, i32) {
    %c0_i32 = arith.constant 0 : i32
    %c0_i32_0 = arith.constant 0 : i32
    %c0_i32_1 = arith.constant 0 : i32
    return %c0_i32, %c0_i32_0 : i32, i32
  }
  func.func @transform_5(%arg0: i32) -> (i32, i32) {
    %c0_i32 = arith.constant 0 : i32
    %c0_i32_0 = arith.constant 0 : i32
    return %arg0, %c0_i32 : i32, i32
  }
}

</mosaic_0001>

<bundles_post_ra>
// kernel: tpu_custom_call.1
= control target key start
LH: loop header
LB: loop body
LE: loop exit
PB: predicated region body
PF: predicated region fallthrough
CT: control target
= control target key end

     0   :  { %s896_s28 = smov 64   ;;  %s897_s8 = smov 96   ;;  %s1190_s0 = inlined_call_operand.vmem [shape: bf16[8,14,32], index: 0, kind: input, shape index: {}]   ;;  %s1191_s1 = inlined_call_operand.vmem [shape: bf16[128,24], index: 1, kind: input, shape index: {}]   ;;  %s1192_s2 = inlined_call_operand.vmem [shape: f32[1,24], index: 2, kind: input, shape index: {}]   ;;  %s1193_s3 = inlined_call_operand.vmem [shape: bf16[24,128], index: 3, kind: input, shape index: {}]   ;;  %s1194_s4 = inlined_call_operand.vmem [shape: f32[1,128], index: 4, kind: input, shape index: {}]   ;;  %s1195_s5 = inlined_call_operand.hbm [shape: f32[8,128], index: 5, kind: output, shape index: {}]  }
   0x1   :  { %v936_v0 = vld [vmem:[%s1190_s0 + $0x10] sm:$0x7f]   ;;  %v941_v1 = vld [vmem:[%s1190_s0 + $0x8] sm:$0x7f]   ;;  %v860_v2 = vld [vmem:[%s1191_s1 + $0x38] sm:$0xff]   ;;  %s898_s9 = smov 32  }
   0x2   :  { %v112_v3 = vrot.slane %v936_v0, 1  ;;  %v106_v4 = vshll.u32 %v936_v0, 16  ;;  %v861_v5 = vld [vmem:[%s1191_s1 + $0x30] sm:$0xff]   ;;  %v84_v6 = vrot.slane %v941_v1, 1  ;;  %v76_v7 = vshrl.u32 %v941_v1, 16  ;;  %793 = vmatprep.subr.bf16.mxu0 %v860_v2  ;;  %829 = vmatprep.subr.bf16.mxu1 %v860_v2  ;;  %v862_v11 = vld [vmem:[%s1191_s1 + $0x28] sm:$0xff]  }
   0x3   :  { %v78_v8 = vshll.u32 %v941_v1, 16  ;;  %v957_v9 = vld [vmem:[%s1190_s0] sm:$0x7f]   ;;  %v104_v10 = vshrl.u32 %v936_v0, 16  ;;  %794 = vmatpush3.bf16.msra.mxu0 %v860_v2  ;;  %v970_v18 = vld [vmem:[%s1190_s0 + $0x18] sm:$0x7f]   ;;  %837 = vmatpush3.bf16.msra.mxu1 %v860_v2 }
   0x4   :  { %113 = vrot.lane.b32.xlu1 %v112_v3, %s896_s28  ;;  %85 = vrot.lane.b32.xlu0 %v84_v6, %s896_s28  ;;  %v87_v12 = vrot.slane %v76_v7, 1  ;;  %v108_v15 = vrot.slane %v106_v4, 1  ;;  %v44_v16 = vshrl.u32 %v957_v9, 16  ;;  %v46_v17 = vshll.u32 %v957_v9, 16  ;;  %v863_v27 = vld [vmem:[%s1191_s1 + $0x20] sm:$0xff]   ;;  %v864_v35 = vld [vmem:[%s1191_s1 + $0x18] sm:$0xff]  }
   0x5   :  { %v88_v13 = vrot.slane %v78_v8, 2  ;;  %v80_v14 = vrot.slane %v78_v8, 1  ;;  %795 = vmatprep.subr.bf16.mxu0 %v861_v5  ;;  %830 = vmatprep.subr.bf16.mxu1 %v861_v5  ;;  %v115_v23 = vrot.slane %v104_v10, 1  ;;  %v116_v24 = vrot.slane %v106_v4, 2  ;;  %v982_v31 = vld [vmem:[%s1190_s0 + $0x28] sm:$0x7f]  }
   0x6   :  { %v48_v21 = vrot.slane %v46_v17, 1  ;;  %v109_v22 = vor.u32 %v108_v15, %v104_v10  ;;  %v134_v25 = vshll.u32 %v970_v18, 16  ;;  %v52_v28 = vrot.slane %v957_v9, 1  ;;  %v994_v37 = vld [vmem:[%s1190_s0 + $0x38] sm:$0x7f]   ;;  %v865_v42 = vld [vmem:[%s1191_s1 + $0x10] sm:$0xff]  }
   0x7   :  { %v89_v19 = vor.u32 %v88_v13, %v87_v12  ;;  %v81_v20 = vor.u32 %v80_v14, %v76_v7  ;;  %796 = vmatpush3.bf16.msra.mxu0 %v861_v5  ;;  %838 = vmatpush3.bf16.msra.mxu1 %v861_v5  ;;  %v55_v29 = vrot.slane %v44_v16, 1  ;;  %v56_v30 = vrot.slane %v46_v17, 2  ;;  %v1005_v44 = vld [vmem:[%s1190_s0 + $0x20] sm:$0x7f]   ;;  %v866_v46 = vld [vmem:[%s1191_s1 + $0x8] sm:$0xff]  }
   0x8   :  { %v49_v26 = vor.u32 %v48_v21, %v44_v16  ;;  %797 = vmatprep.subr.bf16.mxu0 %v862_v11  ;;  %831 = vmatprep.subr.bf16.mxu1 %v862_v11  ;;  %v117_v32 = vor.u32 %v116_v24, %v115_v23  ;;  %v132_v33 = vshrl.u32 %v970_v18, 16  ;;  %v136_v34 = vrot.slane %v134_v25, 1 }
   0x9   :  { %90 = vrot.lane.b32.xlu1 %v89_v19, %s897_s8  ;;  %82 = vrot.lane.b32.xlu0 %v81_v20, %s898_s9  ;;  %v190_v36 = vshll.u32 %v982_v31, 16  ;;  %v57_v38 = vor.u32 %v56_v30, %v55_v29  ;;  %v144_v41 = vrot.slane %v134_v25, 2  ;;  %v140_v43 = vrot.slane %v970_v18, 1 }
   0xa   :  { %v137_v39 = vor.u32 %v136_v34, %v132_v33  ;;  %v143_v40 = vrot.slane %v132_v33, 1  ;;  %v188_v45 = vshrl.u32 %v982_v31, 16  ;;  %v246_v49 = vshll.u32 %v994_v37, 16 }
   0xb   :  { %798 = vmatpush3.bf16.msra.mxu0 %v862_v11  ;;  %839 = vmatpush3.bf16.msra.mxu1 %v862_v11  ;;  %v192_v48 = vrot.slane %v190_v36, 1  ;;  %v196_v50 = vrot.slane %v982_v31, 1  ;;  %v244_v52 = vshrl.u32 %v994_v37, 16  ;;  %v200_v53 = vrot.slane %v190_v36, 2 }
   0xc   :  { %799 = vmatprep.subr.bf16.mxu0 %v863_v27  ;;  %832 = vmatprep.subr.bf16.mxu1 %v863_v27  ;;  %v145_v47 = vor.u32 %v144_v41, %v143_v40  ;;  %v199_v51 = vrot.slane %v188_v45, 1  ;;  %v248_v55 = vrot.slane %v246_v49, 1  ;;  %v162_v56 = vshll.u32 %v1005_v44, 16 }
   0xd   :  { %110 = vrot.lane.b32.xlu1 %v109_v22, %s898_s9  ;;  %50 = vrot.lane.b32.xlu0 %v49_v26, %s898_s9  ;;  %v193_v54 = vor.u32 %v192_v48, %v188_v45 }
   0xf   :  { %800 = vmatpush3.bf16.msra.mxu0 %v863_v27  ;;  %840 = vmatpush3.bf16.msra.mxu1 %v863_v27 }
  0x10   :  { %801 = vmatprep.subr.bf16.mxu0 %v864_v35  ;;  %833 = vmatprep.subr.bf16.mxu1 %v864_v35 }
  0x11   :  { %118 = vrot.lane.b32.xlu1 %v117_v32, %s897_s8  ;;  %53 = vrot.lane.b32.xlu0 %v52_v28, %s896_s28 }
  0x13   :  { %802 = vmatpush3.bf16.msra.mxu0 %v864_v35  ;;  %841 = vmatpush3.bf16.msra.mxu1 %v864_v35 }
  0x14   :  { %803 = vmatprep.subr.bf16.mxu0 %v865_v42  ;;  %834 = vmatprep.subr.bf16.mxu1 %v865_v42 }
  0x15   :  { %58 = vrot.lane.b32.xlu1 %v57_v38, %s897_s8  ;;  %138 = vrot.lane.b32.xlu0 %v137_v39, %s898_s9 }
  0x17   :  { %804 = vmatpush3.bf16.msra.mxu0 %v865_v42 }
  0x19   :  { %146 = vrot.lane.b32.xlu1 %v145_v47, %s897_s8  ;;  %141 = vrot.lane.b32.xlu0 %v140_v43, %s896_s28 }
  0x1a   :  { %10 = vsyncpa [#allocation3], 0  ;;  %805 = vmatprep.subr.bf16.mxu0 %v866_v46  ;;  %v867_v57 = vld [vmem:[%s1191_s1] sm:$0xff]   ;;  %842 = vmatpush3.bf16.msra.mxu1 %v865_v42  ;;  %v249_v58 = vor.u32 %v248_v55, %v244_v52  ;;  %v201_v59 = vor.u32 %v200_v53, %v199_v51  ;;  %v160_v60 = vshrl.u32 %v1005_v44, 16  ;;  %v164_v61 = vrot.slane %v162_v56, 1  ;;  %s902_s7 = smov [#allocation2]  }
  0x1b   :  { %835 = vmatprep.subr.bf16.mxu1 %v866_v46  ;;  %806 = vmatpush3.bf16.msra.mxu0 %v866_v46  ;;  %v1028_v62 = vld [vmem:[%s1190_s0 + $0x30] sm:$0x7f]   ;;  %v252_v63 = vrot.slane %v994_v37, 1  ;;  %v255_v3 = vrot.slane %v244_v52, 1  ;;  %v256_v4 = vrot.slane %v246_v49, 2  ;;  %v168_v6 = vrot.slane %v1005_v44, 1 }
  0x1c   :  { %807 = vmatprep.subr.bf16.mxu0 %v867_v57  ;;  %v165_v2 = vor.u32 %v164_v61, %v160_v60  ;;  %v218_v5 = vshll.u32 %v1028_v62, 16  ;;  %v171_v7 = vrot.slane %v160_v60, 1  ;;  %v172_v10 = vrot.slane %v162_v56, 2 }
  0x1d   :  { %197 = vrot.lane.b32.xlu1 %v196_v50, %s896_s28  ;;  %194 = vrot.lane.b32.xlu0 %v193_v54, %s898_s9  ;;  %v257_v8 = vor.u32 %v256_v4, %v255_v3  ;;  %v216_v11 = vshrl.u32 %v1028_v62, 16  ;;  %v224_v17 = vrot.slane %v1028_v62, 1  ;;  %vm60_vm0 = vcmask 261120  }
  0x1e   :  { %843 = vmatpush3.bf16.msra.mxu1 %v866_v46  ;;  %v220_v12 = vrot.slane %v218_v5, 1  ;;  %v173_v13 = vor.u32 %v172_v10, %v171_v7  ;;  %v228_v16 = vrot.slane %v218_v5, 2  ;;  %vm63_vm1 = vcmask 523264  }
  0x1f   :  { %836 = vmatprep.subr.bf16.mxu1 %v867_v57  ;;  %808 = vmatpush3.bf16.msra.mxu0 %v867_v57  ;;  %v227_v15 = vrot.slane %v216_v11, 1  ;;  %vm66_vm2 = vcmask 785408   ;;  %vm305_vm3 = vcmask 1045504   ;;  %vm306_vm4 = vsmask.f32 5376 }
  0x20   :  { %v221_v14 = vor.u32 %v220_v12, %v216_v11  ;;  %vm307_vm5 = vmand %vm305_vm3, %vm306_vm4  ;;  %vm309_vm6 = vcmask 1042432   ;;  %vm314_vm7 = vcmask 1040384   ;;  %vm315_vm8 = vsmask.f32 256 }
  0x21   :  { %250 = vrot.lane.b32.xlu1 %v249_v58, %s898_s9  ;;  %202 = vrot.lane.b32.xlu0 %v201_v59, %s897_s8  ;;  %v229_v19 = vor.u32 %v228_v16, %v227_v15  ;;  %vm323_vm9 = vcmask 1043456   ;;  %vm324_vm10 = vsmask.f32 3328  ;;  %vm316_vm11 = vmand %vm314_vm7, %vm315_vm8  ;;  %vm332_vm13 = vcmask 1046528  }
  0x22   :  { %844 = vmatpush3.bf16.msra.mxu1 %v867_v57  ;;  %vm325_vm12 = vmand %vm323_vm9, %vm324_vm10  ;;  %vm333_vm14 = vsmask.f32 6400  ;;  %vm526_vm8 = vcmask 1044480   ;;  %vm515_vm10 = vcmask 190464  }
  0x23   :  { %vm334_vm15 = vmand %vm332_vm13, %vm333_vm14 }
  0x25   :  { %253 = vrot.lane.b32.xlu1 %v252_v63, %s896_s28  ;;  %166 = vrot.lane.b32.xlu0 %v165_v2, %s898_s9 }
  0x29   :  { %258 = vrot.lane.b32.xlu1 %v257_v8, %s897_s8  ;;  %169 = vrot.lane.b32.xlu0 %v168_v6, %s896_s28 }
  0x2d   :  { %174 = vrot.lane.b32.xlu0 %v173_v13, %s897_s8  ;;  %222 = vrot.lane.b32.xlu1 %v221_v14, %s898_s9 }
  0x31   :  { %225 = vrot.lane.b32.xlu0 %v224_v17, %s896_s28  ;;  %230 = vrot.lane.b32.xlu1 %v229_v19, %s897_s8 }
  0x76   :  { %v114_v20 = vpop.permute.xlu1 %113  ;;  %v86_v21 = vpop.permute.xlu0 %85 }
  0x7b   :  { %v91_v22 = vpop.permute.xlu1 %90  ;;  %v83_v23 = vpop.permute.xlu0 %82 }
  0x7c   :  { %v93_v24 = vsel %vm60_vm0, %v941_v1, %v83_v23 }
  0x7d   :  { %v95_v25 = vsel %vm63_vm1, %v93_v24, %v86_v21 }
  0x7e   :  { %v97_v26 = vsel %vm66_vm2, %v95_v25, %v91_v22 }
  0x7f   :  { %v111_v27 = vpop.permute.xlu1 %110  ;;  %v51_v28 = vpop.permute.xlu0 %50  ;;  %v266_v29 = vshrl.u32 %v97_v26, 16  ;;  %v269_v30 = vshll.u32 %v97_v26, 16 }
  0x80   :  { %v121_v32 = vsel %vm60_vm0, %v936_v0, %v111_v27  ;;  %v62_v39 = vsel %vm60_vm0, %v957_v9, %v51_v28 }
  0x81   :  { %v123_v33 = vsel %vm63_vm1, %v121_v32, %v114_v20  ;;  %v268_v36 = vrot.slane %v266_v29, 2  ;;  %v271_v38 = vrot.slane %v269_v30, 3 }
  0x83   :  { %v119_v34 = vpop.permute.xlu1 %118  ;;  %v54_v35 = vpop.permute.xlu0 %53  ;;  %v272_v43 = vor.u32 %v271_v38, %v268_v36  ;;  %v869_v38 = vld [vmem:[%s1193_s3] sm:$0xff]  }
  0x84   :  { %v125_v1 = vsel %vm66_vm2, %v123_v33, %v119_v34  ;;  %v65_v41 = vsel %vm63_vm1, %v62_v39, %v54_v35  ;;  %v899_v35 = vmov 0.0  }
  0x85   :  { %v275_v40 = vrot.slane %v125_v1, 5  ;;  %821 = vmatprep.subr.bf16.mxu1 %v899_v35  ;;  %v498_v1 = vlaneseq }
  0x87   :  { %v59_v42 = vpop.permute.xlu1 %58  ;;  %v139_v0 = vpop.permute.xlu0 %138  ;;  %v312_v47 = vsel %vm309_vm6, %v272_v43, %v275_v40  ;;  %v502_v39 = vand.u32 127, %v498_v1 }
  0x88   :  { %v68_v45 = vsel %vm66_vm2, %v65_v41, %v59_v42  ;;  %v149_v9 = vsel %vm60_vm0, %v970_v18, %v139_v0  ;;  %v901_v42 = vmov 0  }
  0x89   :  { %v308_v46 = vsel %vm307_vm5, %v68_v45, %v272_v43  ;;  %v1094_v45 = vld [vmem:[%s1192_s2] ss:$0 sm:$0xff] }
  0x8a   :  { %809 = vmatprep.mubr.bf16.mxu0 %v308_v46 }
  0x8b   :  { %v147_v48 = vpop.permute.xlu1 %146  ;;  %810 = vmatmul.mubr.bf16.vlgmr.msra.gmra.mxu0 %v312_v47  ;;  %v142_v49 = vpop.permute.xlu0 %141  ;;  %v499_v47 = vshrl.u32 %v498_v1, 7 }
  0x8c   :  { %v151_v52 = vsel %vm63_vm1, %v149_v9, %v142_v49 }
  0x8d   :  { %v153_v54 = vsel %vm66_vm2, %v151_v52, %v147_v48 }
  0x8e   :  { %v277_v58 = vshrl.u32 %v153_v54, 16  ;;  %v280_v6 = vshll.u32 %v153_v54, 16 }
  0x8f   :  { %v198_v50 = vpop.permute.xlu1 %197  ;;  %v195_v51 = vpop.permute.xlu0 %194 }
  0x90   :  { %v205_v53 = vsel %vm60_vm0, %v982_v31, %v195_v51  ;;  %v279_v2 = vrot.slane %v277_v58, 7 }
  0x91   :  { %v207_v57 = vsel %vm63_vm1, %v205_v53, %v198_v50  ;;  %v500_v53 = vadd.s32 8, %v499_v47 }
  0x92   :  { %v282_v11 = vor.u32 %v280_v6, %v279_v2 }
  0x93   :  { %v251_v55 = vpop.permute.xlu1 %250  ;;  %v203_v56 = vpop.permute.xlu0 %202 }
  0x94   :  { %v209_v59 = vsel %vm66_vm2, %v207_v57, %v203_v56  ;;  %v261_v3 = vsel %vm60_vm0, %v994_v37, %v251_v55  ;;  %v317_v22 = vsel %vm316_vm11, %v275_v40, %v282_v11  ;;  %vm513_vm11 = vcmask 195584  }
  0x95   :  { %v287_v63 = vshrl.u32 %v209_v59, 16  ;;  %v290_v18 = vshll.u32 %v209_v59, 16 }
  0x97   :  { %v254_v60 = vpop.permute.xlu1 %253  ;;  %v167_v61 = vpop.permute.xlu0 %166  ;;  %v289_v8 = vrot.slane %v287_v63, 4  ;;  %v292_v10 = vrot.slane %v290_v18, 5 }
  0x98   :  { %v263_v4 = vsel %vm63_vm1, %v261_v3, %v254_v60  ;;  %v177_v12 = vsel %vm60_vm0, %v1005_v44, %v167_v61 }
  0x99   :  { %v293_v19 = vor.u32 %v292_v10, %v289_v8 }
  0x9b   :  { %v259_v31 = vpop.permute.xlu1 %258  ;;  %v170_v5 = vpop.permute.xlu0 %169 }
  0x9c   :  { %v265_v7 = vsel %vm66_vm2, %v263_v4, %v259_v31  ;;  %v179_v37 = vsel %vm63_vm1, %v177_v12, %v170_v5 }
  0x9d   :  { %v297_v13 = vshrl.u32 %v265_v7, 16  ;;  %v300_v14 = vshll.u32 %v265_v7, 16 }
  0x9f   :  { %v175_v15 = vpop.permute.xlu0 %174  ;;  %v223_v16 = vpop.permute.xlu1 %222  ;;  %v299_v21 = vrot.slane %v297_v13, 1  ;;  %v302_v23 = vrot.slane %v300_v14, 2 }
  0xa0   :  { %v181_v17 = vsel %vm66_vm2, %v179_v37, %v175_v15  ;;  %v233_v44 = vsel %vm60_vm0, %v1028_v62, %v223_v16  ;;  %v868_v62 = vld [vmem:[%s1193_s3 + $0x8] ss:$0 sps:$4 sm:$0xff]   ;;  %vm900_vm0 = vmmov 0  }
  0xa1   :  { %v285_v20 = vrot.slane %v181_v17, 2  ;;  %v303_v32 = vor.u32 %v302_v23, %v299_v21  ;;  %v685_v36 = vsel %vm323_vm9, %v868_v62, 0 }
  0xa3   :  { %v226_v24 = vpop.permute.xlu0 %225  ;;  %v231_v25 = vpop.permute.xlu1 %230  ;;  %v321_v26 = vsel %vm305_vm3, %v317_v22, %v285_v20  ;;  %v326_v27 = vsel %vm325_vm12, %v285_v20, %v293_v19  ;;  %vm545_vm12 = vcmask 1041408  }
  0xa4   :  { %v235_v28 = vsel %vm63_vm1, %v233_v44, %v226_v24  ;;  %813 = vmatprep.mubr.bf16.mxu0 %v321_v26  ;;  %vm503_vm1 = vcmp.ge.s32.totalorder %v502_v39, 8 }
  0xa5   :  { %v237_v29 = vsel %vm66_vm2, %v235_v28, %v231_v25  ;;  %814 = vmatmul.mubr.bf16.gmra.mxu0 %v326_v27  ;;  %v504_v0 = vsel %vm503_vm1, 1, %v901_v42  ;;  %vm506_vm2 = vcmp.ge.s32.totalorder %v502_v39, 16 }
  0xa6   :  { %v296_v30 = vrot.slane %v237_v29, 7  ;;  %v505_v48 = vadd.s32 9, %v504_v0  ;;  %v507_v50 = vsel %vm506_vm2, 1, %v901_v42 }
  0xa8   :  { %v330_v33 = vsel %vm314_vm7, %v293_v19, %v296_v30  ;;  %v508_v54 = vadd.s32 %v507_v50, %v505_v48 }
  0xa9   :  { %v335_v34 = vsel %vm334_vm15, %v330_v33, %v303_v32 }
  0xaa   :  { %817 = vmatprep.mubr.bf16.mxu1 %v335_v34  ;;  %vm1099_vm4 = vcmp.lt.s32.totalorder %v500_v53, %v508_v54  ;;  %vm1103_vm5 = vcmp.lt.s32.totalorder %v499_v47, %v508_v54 }
  0xab   :  { %818 = vmatmul.mubr.bf16.vlgmr.msra.gmra.mxu1 %v303_v32 }
  0xac   :  { %822 = vmatpush3.bf16.msra.mxu1 %v685_v36  ;;  %825 = vmatprep.mubr.msk.bf16.mxu1 %vm900_vm0, %v899_v35 }
  0xad   :  { %823 = vmatprep.subr.bf16.mxu1 %v899_v35 }
  0xb0   :  { %824 = vmatpush3.bf16.msra.mxu1 %v869_v38 }
 0x14b   :  { %v811_v40 = vpop.f32.mrf.mxu0 }
 0x14c   :  { %v450_v9 = vadd.f32 %v811_v40, %v1094_v45 }
 0x14d   :  { %v441_v41 = vpop.f32.mrf.mxu0 }
 0x14e   :  { %v442_v51 = vadd.f32 %v1094_v45, %v441_v41  ;;  %v489_v55 = vmax.f32 %v450_v9, 0.0 }
 0x14f   :  { %v812_v43 = vpop.f32.mrf.mxu0 }
 0x150   :  { %v487_v56 = vmax.f32 %v442_v51, 0.0  ;;  %v528_v60 = vrot.slane %v489_v55, 3  ;;  %v453_v61 = vadd.f32 %v812_v43, %v1094_v45  ;;  %v546_v12 = vrot.slane %v489_v55, 6 }
 0x151   :  { %v444_v46 = vpop.f32.mrf.mxu0 }
 0x152   :  { %v445_v49 = vadd.f32 %v1094_v45, %v444_v46  ;;  %v511_v18 = vsel %vm1103_vm5, %v487_v56, 0.0  ;;  %v490_v4 = vmax.f32 %v453_v61, 0.0  ;;  %v533_v7 = vsel %vm1099_vm4, %v528_v60, 0.0 }
 0x153   :  { %v514_v31 = vsel %vm513_vm11, %v511_v18, -inf  ;;  %v535_v11 = vsel %vm515_vm10, %v533_v7, -inf }
 0x154   :  { %v488_v52 = vmax.f32 %v445_v49, 0.0  ;;  %v547_v8 = vrot.slane %v490_v4, 6 }
 0x156   :  { %v527_v57 = vrot.slane %v488_v52, 3  ;;  %v512_v63 = vsel %vm1099_vm4, %v488_v52, 0.0  ;;  %v548_v16 = vsel %vm545_vm12, %v546_v12, %v547_v8 }
 0x157   :  { %v516_v3 = vsel %vm515_vm10, %v512_v63, -inf  ;;  %v553_v23 = vsel %vm1103_vm5, %v548_v16, 0.0 }
 0x158   :  { %v529_v2 = vsel %vm526_vm8, %v527_v57, %v528_v60  ;;  %v517_v6 = vmax.f32 %v514_v31, %v516_v3  ;;  %v555_v32 = vsel %vm513_vm11, %v553_v23, -inf }
 0x159   :  { %v532_v5 = vsel %vm1103_vm5, %v529_v2, 0.0 }
 0x15a   :  { %v534_v10 = vsel %vm513_vm11, %v532_v5, -inf  ;;  %v518_v13 = vrot.slane %v517_v6, 4 }
 0x15b   :  { %v536_v37 = vmax.f32 %v534_v10, %v535_v11 }
 0x15c   :  { %v519_v21 = vmax.f32 %v517_v6, %v518_v13 }
 0x15d   :  { %v537_v44 = vrot.slane %v536_v37, 4 }
 0x15e   :  { %v520_v33 = vrot.slane %v519_v21, 2 }
 0x15f   :  { %v538_v35 = vmax.f32 %v536_v37, %v537_v44 }
 0x160   :  { %v1138_v52 = vmax.f32 %v519_v21, %v520_v33 }
 0x161   :  { %v539_v53 = vrot.slane %v538_v35, 2 }
 0x163   :  { %v540_v13 = vmax.f32 %v538_v35, %v539_v53 }
 0x165   :  { %v815_v14 = vpop.f32.mrf.mxu0 }
 0x166   :  { %v466_v15 = vadd.f32 %v815_v14, %v1094_v45 }
 0x167   :  { %v457_v17 = vpop.f32.mrf.mxu0 }
 0x168   :  { %v493_v19 = vmax.f32 %v466_v15, 0.0  ;;  %v458_v20 = vadd.f32 %v1094_v45, %v457_v17 }
 0x169   :  { %v816_v22 = vpop.f32.mrf.mxu0 }
 0x16a   :  { %v491_v24 = vmax.f32 %v458_v20, 0.0  ;;  %v469_v25 = vadd.f32 %v816_v22, %v1094_v45  ;;  %v585_v26 = vrot.slane %v493_v19, 4  ;;  %v602_v40 = vrot.slane %v493_v19, 7 }
 0x16b   :  { %v460_v27 = vpop.f32.mrf.mxu0  ;;  %v819_v28 = vpop.f32.mrf.mxu1 }
 0x16c   :  { %v549_v29 = vrot.slane %v491_v24, 6  ;;  %v494_v30 = vmax.f32 %v469_v25, 0.0  ;;  %v461_v34 = vadd.f32 %v1094_v45, %v460_v27  ;;  %v590_v39 = vsel %vm1099_vm4, %v585_v26, 0.0 }
 0x16d   :  { %v473_v62 = vpop.f32.mrf.mxu1  ;;  %v566_v46 = vrot.slane %v491_v24, 1  ;;  %v482_v47 = vadd.f32 %v819_v28, %v1094_v45  ;;  %v592_v54 = vsel %vm515_vm10, %v590_v39, -inf  ;;  %v522_v27 = vrot.slane %v1138_v52, 1 }
 0x16e   :  { %v550_v36 = vsel %vm545_vm12, %v547_v8, %v549_v29  ;;  %v603_v38 = vrot.slane %v494_v30, 7  ;;  %v474_v1 = vadd.f32 %v1094_v45, %v473_v62  ;;  %v492_v42 = vmax.f32 %v461_v34, 0.0 }
 0x16f   :  { %v554_v41 = vsel %vm1099_vm4, %v550_v36, 0.0  ;;  %v820_v0 = vpop.f32.mrf.mxu1  ;;  %v497_v7 = vmax.f32 %v482_v47, 0.0  ;;  %v541_v28 = vrot.slane %v540_v13, 1 }
 0x170   :  { %v556_v43 = vsel %vm515_vm10, %v554_v41, -inf  ;;  %v495_v48 = vmax.f32 %v474_v1, 0.0  ;;  %v604_v9 = vsel %vm314_vm7, %v602_v40, %v603_v38  ;;  %v567_v50 = vrot.slane %v492_v42, 1 }
 0x171   :  { %v557_v49 = vmax.f32 %v555_v32, %v556_v43  ;;  %v584_v51 = vrot.slane %v492_v42, 4  ;;  %v476_v63 = vpop.f32.mrf.mxu1  ;;  %v609_v18 = vsel %vm1103_vm5, %v604_v9, 0.0  ;;  %v639_v22 = vrot.slane %v497_v7, 5 }
 0x172   :  { %v605_v55 = vrot.slane %v495_v48, 7  ;;  %v568_v57 = vsel %vm332_vm13, %v566_v46, %v567_v50  ;;  %v572_v60 = vsel %vm1099_vm4, %v567_v50, 0.0  ;;  %v477_v12 = vadd.f32 %v1094_v45, %v476_v63 }
 0x173   :  { %v558_v56 = vrot.slane %v557_v49, 4  ;;  %v586_v61 = vsel %vm323_vm9, %v584_v51, %v585_v26  ;;  %v571_v2 = vsel %vm1103_vm5, %v568_v57, 0.0  ;;  %v574_v3 = vsel %vm515_vm10, %v572_v60, -inf }
 0x174   :  { %v589_v4 = vsel %vm1103_vm5, %v586_v61, 0.0  ;;  %v573_v5 = vsel %vm513_vm11, %v571_v2, -inf  ;;  %v606_v11 = vsel %vm314_vm7, %v603_v38, %v605_v55  ;;  %v611_v37 = vsel %vm513_vm11, %v609_v18, -inf }
 0x175   :  { %v559_v31 = vmax.f32 %v557_v49, %v558_v56  ;;  %v591_v6 = vsel %vm513_vm11, %v589_v4, -inf  ;;  %v575_v8 = vmax.f32 %v573_v5, %v574_v3  ;;  %v610_v15 = vsel %vm1099_vm4, %v606_v11, 0.0 }
 0x176   :  { %v593_v10 = vmax.f32 %v591_v6, %v592_v54  ;;  %v612_v19 = vsel %vm515_vm10, %v610_v15, -inf  ;;  %v496_v20 = vmax.f32 %v477_v12, 0.0  ;;  %v621_v44 = vrot.slane %v495_v48, 2 }
 0x177   :  { %v560_v14 = vrot.slane %v559_v31, 2  ;;  %v576_v16 = vrot.slane %v575_v8, 4  ;;  %v613_v23 = vmax.f32 %v611_v37, %v612_v19  ;;  %v644_v35 = vsel %vm1099_vm4, %v639_v22, 0.0 }
 0x178   :  { %v594_v17 = vrot.slane %v593_v10, 4  ;;  %v622_v26 = vrot.slane %v496_v20, 2  ;;  %v638_v45 = vrot.slane %v496_v20, 5  ;;  %v542_v0 = vmax.f32 %v540_v13, %v541_v28 }
 0x179   :  { %v561_v21 = vmax.f32 %v559_v31, %v560_v14  ;;  %v577_v24 = vmax.f32 %v575_v8, %v576_v16  ;;  %v614_v30 = vrot.slane %v613_v23, 4  ;;  %v646_v49 = vsel %vm515_vm10, %v644_v35, -inf  ;;  %v772_v16 = vld [vmem:[%s1194_s4] ss:$0 sm:$0xff]  ;;  %s747_s4 = sshll.u32 %s902_s7, 4  ;;  %s748_s4 = int_to_ptr.vmem [resolvable:$true] %s747_s4 }
 0x17a   :  { %v595_v25 = vmax.f32 %v593_v10, %v594_v17  ;;  %v623_v34 = vsel %vm305_vm3, %v621_v44, %v622_v26  ;;  %v627_v62 = vsel %vm1099_vm4, %v622_v26, 0.0  ;;  %v640_v42 = vsel %vm309_vm6, %v638_v45, %v639_v22  ;;  %s874_s8 = scalar_lea.vmem %s748_s4, 128  ;;  %p879_p1 = scmp.lt.s32.totalorder %s748_s4, %s748_s4 }
 0x17b   :  { %v562_v29 = vrot.slane %v561_v21, 1  ;;  %v578_v32 = vrot.slane %v577_v24, 2  ;;  %v615_v36 = vmax.f32 %v613_v23, %v614_v30  ;;  %v626_v38 = vsel %vm1103_vm5, %v623_v34, 0.0  ;;  %p875_p0 = scmp.ne.s32.totalorder %s748_s4, %s874_s8  ;;  %p880_p2 = scmp.lt.s32.totalorder %s874_s8, %s874_s8 }
 0x17c   :  { %v596_v33 = vrot.slane %v595_v25, 2  ;;  %v629_v1 = vsel %vm515_vm10, %v627_v62, -inf  ;;  %v628_v41 = vsel %vm513_vm11, %v626_v38, -inf  ;;  %v643_v47 = vsel %vm1103_vm5, %v640_v42, 0.0 }
 0x17d   :  { %v579_v39 = vmax.f32 %v577_v24, %v578_v32  ;;  %v616_v43 = vrot.slane %v615_v36, 2  ;;  %v630_v46 = vmax.f32 %v628_v41, %v629_v1  ;;  %v563_v58 = vmax.f32 %v561_v21, %v562_v29  ;;  %p881_p3 = por %p880_p2, %p879_p1 }
 0x17e   :  { %v597_v40 = vmax.f32 %v595_v25, %v596_v33  ;;  %v645_v9 = vsel %vm513_vm11, %v643_v47, -inf  ;;  %v523_v55 = vmax.f32 %v1138_v52, %v522_v27 }
 0x17f   :  { %v580_v48 = vrot.slane %v579_v39, 1  ;;  %v617_v51 = vmax.f32 %v615_v36, %v616_v43  ;;  %v631_v53 = vrot.slane %v630_v46, 4  ;;  %v647_v54 = vmax.f32 %v645_v9, %v646_v49  ;;  %p882_p4 = pnand %p881_p3, %p875_p0 }
 0x180   :  { %v598_v50 = vrot.slane %v597_v40, 1  ;;  %v654_v61 = vsel %vm314_vm7, %v523_v55, %v542_v0 }
 0x181   :  { %v581_v56 = vmax.f32 %v579_v39, %v580_v48  ;;  %v632_v57 = vmax.f32 %v630_v46, %v631_v53  ;;  %v648_v60 = vrot.slane %v647_v54, 4  ;;  %v618_v63 = vrot.slane %v617_v51, 1 }
 0x182   :  { %v599_v59 = vmax.f32 %v597_v40, %v598_v50  ;;  %v655_v18 = vsel %vm545_vm12, %v654_v61, %v563_v58 }
 0x183   :  { %v633_v2 = vrot.slane %v632_v57, 2  ;;  %v649_v3 = vmax.f32 %v647_v54, %v648_v60  ;;  %v656_v4 = vsel %vm309_vm6, %v655_v18, %v581_v56  ;;  %v619_v6 = vmax.f32 %v617_v51, %v618_v63 }
 0x184   :  { %v657_v52 = vsel %vm323_vm9, %v656_v4, %v599_v59 }
 0x185   :  { %v634_v31 = vmax.f32 %v632_v57, %v633_v2  ;;  %v650_v5 = vrot.slane %v649_v3, 2  ;;  %v658_v12 = vsel %vm526_vm8, %v657_v52, %v619_v6 }
 0x187   :  { %v635_v7 = vrot.slane %v634_v31, 1  ;;  %v651_v8 = vmax.f32 %v649_v3, %v650_v5 }
 0x189   :  { %v636_v10 = vmax.f32 %v634_v31, %v635_v7  ;;  %v652_v11 = vrot.slane %v651_v8, 1 }
 0x18b   :  { %v653_v13 = vmax.f32 %v651_v8, %v652_v11  ;;  %v659_v14 = vsel %vm305_vm3, %v658_v12, %v636_v10 }
 0x18d   :  { %v660_v37 = vsel %vm332_vm13, %v659_v14, %v653_v13 }
 0x18e   :  { %v661_v15 = vpack.c.bf16 %v660_v37, %v660_v37 }
 0x190   :  { %826 = vmatmul.mubr.msk.bf16.vlgmr.msra.gmra.mxu1 %vm513_vm11, %v661_v15 }
 0x250   :  { %v721_v17 = vpop.f32.mrf.mxu1 }
 0x251   :  { %v722_v19 = vadd.f32 %v772_v16, %v721_v17 }
 0x252   :  { %v827_v20 = vpop.f32.mrf.mxu1 }
 0x253   :  { %v727_v21 = vmul.f32 %v722_v19, %v722_v19 }
 0x254   :  { %v724_v22 = vpop.f32.mrf.mxu1 }
 0x255   :  { %728 = vadd.xlane.f32.xlu0 %v727_v21 }
 0x256   :  { %v828_v23 = vpop.f32.mrf.mxu1 }
 0x2de   :  { %v729_v44 = vpop.xlane.xlu0 %728 }
 0x2df   :  { %870 = vrsqrt.f32 %v729_v44  ;;  %vm732_vm3 = vcmp.eq.f32.partialorder %v729_v44, inf  ;;  %v735_v26 = vand.u32 2147483648, %v729_v44  ;;  %vm734_vm6 = vcmp.eq.f32.partialorder %v729_v44, 0.0 }
 0x2ec   :  { %v871_v24 = vpop.eup %870 }
 0x2ed   :  { %v731_v25 = vmul.f32 %v871_v24, %v729_v44 }
 0x2ef   :  { %v733_v45 = vsel %vm732_vm3, %v729_v44, %v731_v25 }
 0x2f0   :  { %v736_v27 = vsel %vm734_vm6, %v735_v26, %v733_v45 }
 0x2f1   :  { %v737_v28 = vmax.f32 %v736_v27, 1e-12 }
 0x2f3   :  { %872 = vrcp.f32 %v737_v28 }
 0x300   :  { %v873_v29 = vpop.eup %872 }
 0x301   :  { %v739_v30 = vmul.f32 %v873_v29, %v722_v19 }
 0x303   :  { %740 = vst [vmem:[#allocation2] sm:$0xff] %v739_v30 }
 0x304   :  { %885 = shalt.err (!%p882_p4)
}
 0x305   :  { %750 = dma.vmem_to_hbm [thread:$0]  %s748_s4, 128, %s1195_s5, [#allocation3]  }
 0x306   :  { %894 = dma.done.wait [#allocation3], 128  }
 0x307   :  { %895 = vsyncadd [#allocation3], 4294967168 }
 0x308   :  { %754 = vsyncpa [#allocation3], 1 }

</bundles_post_ra>
